<compile_context>
chip_gen: v7x
topology: tpu7x:2x2x1
jax: 0.10.0
libtpu: 0.0.40
codegen_flags: <defaults>
</compile_context>

<pallas_src>
import jax
import jax.numpy as jnp
from jax import lax
from jax.experimental import pallas as pl
from jax.experimental.pallas import tpu as pltpu


def mlp_kernel(x_ref,
               w1_ref, b1_ref,
               w2_ref, b2_ref,
               w3_ref, b3_ref,
               w4_ref, b4_ref,
               o_ref):
    # Layer 1: (bt, D) @ (D, 64) on the MXU, f32 accumulation; bias+ReLU in f32 (VPU).
    h = jnp.dot(x_ref[...], w1_ref[...], preferred_element_type=jnp.float32)
    h = jnp.maximum(h + b1_ref[...], 0.0)
    # dropout1: identity (eval mode)

    # Layer 2: (bt, 64) @ (64, 32)
    h = jnp.dot(h.astype(w2_ref.dtype), w2_ref[...],
                preferred_element_type=jnp.float32)
    h = jnp.maximum(h + b2_ref[...], 0.0)
    # dropout2: identity (eval mode)

    # Layer 3: (bt, 32) @ (32, 16)
    h = jnp.dot(h.astype(w3_ref.dtype), w3_ref[...],
                preferred_element_type=jnp.float32)
    h = jnp.maximum(h + b3_ref[...], 0.0)          # (bt, 16) f32

    # Layer 4 folded into the lane-dense output: (1, 16) x (bt, 16)^T -> (1, bt).
    # NT contraction (same pattern as q @ k^T) puts batch on the lane axis so
    # the output store is unmasked / lane-dense.
    y = lax.dot_general(
        w4_ref[...], h.astype(w4_ref.dtype),
        dimension_numbers=(((1,), (1,)), ((), ())),
        preferred_element_type=jnp.float32)         # (1, bt)
    o_ref[...] = (y + b4_ref[...]).astype(o_ref.dtype)


def _round_up(v, m):
    return (v + m - 1) // m * m


def heuristic_model_forward(x, params, *, block_b=1024,
                            compute_dtype=jnp.bfloat16):
    """x: (B, input_dim) float32 -> (B, 1) float32."""
    B, D = x.shape

    # Batch tile: multiple of 128 (lane-dense output), capped at block_b.
    block_b = max(128, _round_up(block_b, 128))
    bt = min(block_b, _round_up(B, 128))
    B_pad = _round_up(B, bt)
    if B_pad != B:
        x = jnp.pad(x, ((0, B_pad - B), (0, 0)))

    # Narrow the streamed input / resident weights; biases (and all in-kernel
    # elementwise math) stay float32.
    xc = x.astype(compute_dtype)
    w1 = params["w1"].astype(compute_dtype)
    w2 = params["w2"].astype(compute_dtype)
    w3 = params["w3"].astype(compute_dtype)
    w4 = params["w4"].astype(compute_dtype)
    b1, b2, b3, b4 = params["b1"], params["b2"], params["b3"], params["b4"]

    grid = (B_pad // bt,)

    def resident(arr):
        # Whole array as one block; same block every step -> stays in VMEM.
        return pl.BlockSpec(arr.shape, lambda i: (0, 0))

    out_row = pl.pallas_call(
        mlp_kernel,
        out_shape=jax.ShapeDtypeStruct((1, B_pad), jnp.float32),
        grid=grid,
        in_specs=[
            pl.BlockSpec((bt, D), lambda i: (i, 0)),   # x streamed over batch
            resident(w1), resident(b1),
            resident(w2), resident(b2),
            resident(w3), resident(b3),
            resident(w4), resident(b4),
        ],
        out_specs=pl.BlockSpec((1, bt), lambda i: (0, i)),  # lane-dense row
        compiler_params=pltpu.CompilerParams(
            dimension_semantics=("parallel",),
            vmem_limit_bytes=48 * 1024 * 1024,
        ),
    )(xc, w1, b1, w2, b2, w3, b3, w4, b4)

    # (1, B_pad) -> (B_pad, 1) is a free reshape; drop padded rows.
    return out_row.reshape(B_pad, 1)[:B]


def init_params(input_dim, key):
    """Deterministic synthetic parameters matching nn.Linear shapes.
    w1/w2/w3 stored (in, out); w4 stored in torch layout (out=1, in=16)."""
    ks = jax.random.split(key, 8)

    def linear(kw, kb, fan_in, fan_out, transpose_w=True):
        bound = 1.0 / jnp.sqrt(jnp.float32(fan_in))
        shape = (fan_in, fan_out) if transpose_w else (fan_out, fan_in)
        w = jax.random.uniform(kw, shape, jnp.float32, -bound, bound)
        b = jax.random.uniform(kb, (1, fan_out), jnp.float32, -bound, bound)
        return w, b

    w1, b1 = linear(ks[0], ks[1], input_dim, 64)
    w2, b2 = linear(ks[2], ks[3], 64, 32)
    w3, b3 = linear(ks[4], ks[5], 32, 16)
    w4, b4 = linear(ks[6], ks[7], 16, 1, transpose_w=False)   # (1, 16)
    return dict(w1=w1, b1=b1, w2=w2, b2=b2, w3=w3, b3=b3, w4=w4, b4=b4)


def reference_forward(x, p, compute_dtype=jnp.float32):
    """Plain-JAX reference mirroring the kernel's mixed-precision recipe."""
    cd = compute_dtype
    h = jnp.dot(x.astype(cd), p["w1"].astype(cd), preferred_element_type=jnp.float32)
    h = jnp.maximum(h + p["b1"], 0.0)
    h = jnp.dot(h.astype(cd), p["w2"].astype(cd), preferred_element_type=jnp.float32)
    h = jnp.maximum(h + p["b2"], 0.0)
    h = jnp.dot(h.astype(cd), p["w3"].astype(cd), preferred_element_type=jnp.float32)
    h = jnp.maximum(h + p["b3"], 0.0)
    y = jnp.dot(h.astype(cd), p["w4"].astype(cd).T, preferred_element_type=jnp.float32)
    return y + p["b4"]


if __name__ == "__main__":
    key = jax.random.PRNGKey(0)
    k_x, k_p = jax.random.split(key)

    batch, input_dim = 200, 32   # small; exercises padding + a 2-step grid (bt=128)
    x = jax.random.normal(k_x, (batch, input_dim), jnp.float32)
    params = init_params(input_dim, k_p)

    # float32 path (tight numerical check vs f32 reference).
    out_f32 = heuristic_model_forward(x, params, block_b=128,
                                      compute_dtype=jnp.float32)
    out_f32 = jax.block_until_ready(out_f32)
    ref_f32 = reference_forward(x, params, compute_dtype=jnp.float32)
    assert out_f32.shape == (batch, 1), out_f32.shape
    assert jnp.allclose(out_f32, ref_f32, atol=5e-4, rtol=5e-4), "f32 mismatch"

    # bfloat16 streaming path (perf default) vs a bf16-mirrored reference.
    out_bf16 = heuristic_model_forward(x, params, block_b=128,
                                       compute_dtype=jnp.bfloat16)
    out_bf16 = jax.block_until_ready(out_bf16)
    ref_bf16 = reference_forward(x, params, compute_dtype=jnp.bfloat16)
    assert out_bf16.shape == (batch, 1), out_bf16.shape
    assert jnp.allclose(out_bf16, ref_bf16, atol=1e-2, rtol=1e-2), "bf16 mismatch"

    print("KERNEL_OK")
</pallas_src>

<mosaic_0001>
module attributes {stable_mosaic.version = 11 : i64} {
  func.func @mlp_kernel(%arg0: i32, %arg1: memref<128x32xf32, #tpu.memory_space<vmem>>, %arg2: memref<32x64xf32, #tpu.memory_space<vmem>>, %arg3: memref<1x64xf32, #tpu.memory_space<vmem>>, %arg4: memref<64x32xf32, #tpu.memory_space<vmem>>, %arg5: memref<1x32xf32, #tpu.memory_space<vmem>>, %arg6: memref<32x16xf32, #tpu.memory_space<vmem>>, %arg7: memref<1x16xf32, #tpu.memory_space<vmem>>, %arg8: memref<1x16xf32, #tpu.memory_space<vmem>>, %arg9: memref<1x1xf32, #tpu.memory_space<vmem>>, %arg10: memref<1x128xf32, #tpu.memory_space<vmem>>) attributes {dimension_semantics = [#tpu.dimension_semantics<parallel>], iteration_bounds = array<i64: 2>, scalar_prefetch = 0 : i64, scratch_operands = 0 : i64, tpu.core_type = #tpu.core_type<tc>, window_params = [{transform_indices = @transform_0, window_bounds = array<i64: 128, 32>}, {pipeline_mode = #tpu.pipeline_mode<synchronous>, transform_indices = @transform_1, window_bounds = array<i64: 32, 64>}, {pipeline_mode = #tpu.pipeline_mode<synchronous>, transform_indices = @transform_2, window_bounds = array<i64: 1, 64>}, {pipeline_mode = #tpu.pipeline_mode<synchronous>, transform_indices = @transform_3, window_bounds = array<i64: 64, 32>}, {pipeline_mode = #tpu.pipeline_mode<synchronous>, transform_indices = @transform_4, window_bounds = array<i64: 1, 32>}, {pipeline_mode = #tpu.pipeline_mode<synchronous>, transform_indices = @transform_5, window_bounds = array<i64: 32, 16>}, {pipeline_mode = #tpu.pipeline_mode<synchronous>, transform_indices = @transform_6, window_bounds = array<i64: 1, 16>}, {pipeline_mode = #tpu.pipeline_mode<synchronous>, transform_indices = @transform_7, window_bounds = array<i64: 1, 16>}, {pipeline_mode = #tpu.pipeline_mode<synchronous>, transform_indices = @transform_8, window_bounds = array<i64: 1, 1>}, {transform_indices = @transform_9, window_bounds = array<i64: 1, 128>}]} {
    %c0 = arith.constant 0 : index
    %c0_0 = arith.constant 0 : index
    %0 = vector.load %arg1[%c0, %c0_0] : memref<128x32xf32, #tpu.memory_space<vmem>>, vector<128x32xf32>
    %c0_1 = arith.constant 0 : index
    %c0_2 = arith.constant 0 : index
    %1 = vector.load %arg2[%c0_1, %c0_2] : memref<32x64xf32, #tpu.memory_space<vmem>>, vector<32x64xf32>
    %cst = arith.constant dense<0.000000e+00> : vector<128x64xf32>
    %2 = tpu.matmul %0, %1, %cst {dimension_numbers = #tpu.dot_dimension_numbers<[1], [0], [0], [1], [0, 0, 1, 1], [], []>} : vector<128x32xf32>, vector<32x64xf32>, vector<128x64xf32> -> vector<128x64xf32>
    %c0_3 = arith.constant 0 : index
    %c0_4 = arith.constant 0 : index
    %3 = vector.load %arg3[%c0_3, %c0_4] : memref<1x64xf32, #tpu.memory_space<vmem>>, vector<1x64xf32>
    %4 = vector.broadcast %3 : vector<1x64xf32> to vector<128x64xf32>
    %5 = arith.addf %2, %4 : vector<128x64xf32>
    %cst_5 = arith.constant 0.000000e+00 : f32
    %6 = vector.broadcast %cst_5 : f32 to vector<128x64xf32>
    %7 = arith.maximumf %5, %6 : vector<128x64xf32>
    %c0_6 = arith.constant 0 : index
    %c0_7 = arith.constant 0 : index
    %8 = vector.load %arg4[%c0_6, %c0_7] : memref<64x32xf32, #tpu.memory_space<vmem>>, vector<64x32xf32>
    %cst_8 = arith.constant dense<0.000000e+00> : vector<128x32xf32>
    %9 = tpu.matmul %7, %8, %cst_8 {dimension_numbers = #tpu.dot_dimension_numbers<[1], [0], [0], [1], [0, 0, 1, 1], [], []>} : vector<128x64xf32>, vector<64x32xf32>, vector<128x32xf32> -> vector<128x32xf32>
    %c0_9 = arith.constant 0 : index
    %c0_10 = arith.constant 0 : index
    %10 = vector.load %arg5[%c0_9, %c0_10] : memref<1x32xf32, #tpu.memory_space<vmem>>, vector<1x32xf32>
    %11 = vector.broadcast %10 : vector<1x32xf32> to vector<128x32xf32>
    %12 = arith.addf %9, %11 : vector<128x32xf32>
    %cst_11 = arith.constant 0.000000e+00 : f32
    %13 = vector.broadcast %cst_11 : f32 to vector<128x32xf32>
    %14 = arith.maximumf %12, %13 : vector<128x32xf32>
    %c0_12 = arith.constant 0 : index
    %c0_13 = arith.constant 0 : index
    %15 = vector.load %arg6[%c0_12, %c0_13] : memref<32x16xf32, #tpu.memory_space<vmem>>, vector<32x16xf32>
    %cst_14 = arith.constant dense<0.000000e+00> : vector<128x16xf32>
    %16 = tpu.matmul %14, %15, %cst_14 {dimension_numbers = #tpu.dot_dimension_numbers<[1], [0], [0], [1], [0, 0, 1, 1], [], []>} : vector<128x32xf32>, vector<32x16xf32>, vector<128x16xf32> -> vector<128x16xf32>
    %c0_15 = arith.constant 0 : index
    %c0_16 = arith.constant 0 : index
    %17 = vector.load %arg7[%c0_15, %c0_16] : memref<1x16xf32, #tpu.memory_space<vmem>>, vector<1x16xf32>
    %18 = vector.broadcast %17 : vector<1x16xf32> to vector<128x16xf32>
    %19 = arith.addf %16, %18 : vector<128x16xf32>
    %cst_17 = arith.constant 0.000000e+00 : f32
    %20 = vector.broadcast %cst_17 : f32 to vector<128x16xf32>
    %21 = arith.maximumf %19, %20 : vector<128x16xf32>
    %c0_18 = arith.constant 0 : index
    %c0_19 = arith.constant 0 : index
    %22 = vector.load %arg8[%c0_18, %c0_19] : memref<1x16xf32, #tpu.memory_space<vmem>>, vector<1x16xf32>
    %cst_20 = arith.constant dense<0.000000e+00> : vector<1x128xf32>
    %23 = tpu.matmul %22, %21, %cst_20 {dimension_numbers = #tpu.dot_dimension_numbers<[1], [1], [0], [0], [0, 0, 1, 0], [], []>} : vector<1x16xf32>, vector<128x16xf32>, vector<1x128xf32> -> vector<1x128xf32>
    %c0_21 = arith.constant 0 : index
    %c0_22 = arith.constant 0 : index
    %24 = vector.load %arg9[%c0_21, %c0_22] : memref<1x1xf32, #tpu.memory_space<vmem>>, vector<1x1xf32>
    %25 = vector.broadcast %24 : vector<1x1xf32> to vector<1x128xf32>
    %26 = arith.addf %23, %25 : vector<1x128xf32>
    %c0_23 = arith.constant 0 : index
    %c0_24 = arith.constant 0 : index
    %27 = vector.load %arg10[%c0_23, %c0_24] : memref<1x128xf32, #tpu.memory_space<vmem>>, vector<1x128xf32>
    tpu.vector_store %arg10[%c0_23, %c0_24], %26 {strides = array<i32>} : memref<1x128xf32, #tpu.memory_space<vmem>>, vector<1x128xf32>,
    return
  }
  func.func @transform_0(%arg0: i32) -> (i32, i32) {
    %c0_i32 = arith.constant 0 : i32
    %c0_i32_0 = arith.constant 0 : i32
    return %arg0, %c0_i32 : i32, i32
  }
  func.func @transform_1(%arg0: i32) -> (i32, i32) {
    %c0_i32 = arith.constant 0 : i32
    %c0_i32_0 = arith.constant 0 : i32
    %c0_i32_1 = arith.constant 0 : i32
    return %c0_i32, %c0_i32_0 : i32, i32
  }
  func.func @transform_2(%arg0: i32) -> (i32, i32) {
    %c0_i32 = arith.constant 0 : i32
    %c0_i32_0 = arith.constant 0 : i32
    %c0_i32_1 = arith.constant 0 : i32
    return %c0_i32, %c0_i32_0 : i32, i32
  }
  func.func @transform_3(%arg0: i32) -> (i32, i32) {
    %c0_i32 = arith.constant 0 : i32
    %c0_i32_0 = arith.constant 0 : i32
    %c0_i32_1 = arith.constant 0 : i32
    return %c0_i32, %c0_i32_0 : i32, i32
  }
  func.func @transform_4(%arg0: i32) -> (i32, i32) {
    %c0_i32 = arith.constant 0 : i32
    %c0_i32_0 = arith.constant 0 : i32
    %c0_i32_1 = arith.constant 0 : i32
    return %c0_i32, %c0_i32_0 : i32, i32
  }
  func.func @transform_5(%arg0: i32) -> (i32, i32) {
    %c0_i32 = arith.constant 0 : i32
    %c0_i32_0 = arith.constant 0 : i32
    %c0_i32_1 = arith.constant 0 : i32
    return %c0_i32, %c0_i32_0 : i32, i32
  }
  func.func @transform_6(%arg0: i32) -> (i32, i32) {
    %c0_i32 = arith.constant 0 : i32
    %c0_i32_0 = arith.constant 0 : i32
    %c0_i32_1 = arith.constant 0 : i32
    return %c0_i32, %c0_i32_0 : i32, i32
  }
  func.func @transform_7(%arg0: i32) -> (i32, i32) {
    %c0_i32 = arith.constant 0 : i32
    %c0_i32_0 = arith.constant 0 : i32
    %c0_i32_1 = arith.constant 0 : i32
    return %c0_i32, %c0_i32_0 : i32, i32
  }
  func.func @transform_8(%arg0: i32) -> (i32, i32) {
    %c0_i32 = arith.constant 0 : i32
    %c0_i32_0 = arith.constant 0 : i32
    %c0_i32_1 = arith.constant 0 : i32
    return %c0_i32, %c0_i32_0 : i32, i32
  }
  func.func @transform_9(%arg0: i32) -> (i32, i32) {
    %c0_i32 = arith.constant 0 : i32
    %c0_i32_0 = arith.constant 0 : i32
    return %c0_i32, %arg0 : i32, i32
  }
}

</mosaic_0001>

<bundles_post_ra>
// kernel: tpu_custom_call.1
= control target key start
LH: loop header
LB: loop body
LE: loop exit
PB: predicated region body
PF: predicated region fallthrough
CT: control target
= control target key end

     0   :  { %s2001_s0 = inlined_call_operand.vmem [shape: f32[256,32], index: 0, kind: input, shape index: {}]   ;;  %s2002_s1 = inlined_call_operand.vmem [shape: f32[32,64], index: 1, kind: input, shape index: {}]   ;;  %s2003_s2 = inlined_call_operand.vmem [shape: f32[1,64], index: 2, kind: input, shape index: {}]   ;;  %s2004_s3 = inlined_call_operand.vmem [shape: f32[64,32], index: 3, kind: input, shape index: {}]   ;;  %s2005_s4 = inlined_call_operand.vmem [shape: f32[1,32], index: 4, kind: input, shape index: {}]   ;;  %s2006_s5 = inlined_call_operand.vmem [shape: f32[32,16], index: 5, kind: input, shape index: {}]   ;;  %s2007_s6 = inlined_call_operand.vmem [shape: f32[1,16], index: 6, kind: input, shape index: {}]   ;;  %s2008_s7 = inlined_call_operand.vmem [shape: f32[1,16], index: 7, kind: input, shape index: {}]   ;;  %s2009_s8 = inlined_call_operand.<no memory space> [shape: f32[1,1], index: 8, kind: input, shape index: {}]   ;;  %s2010_s9 = inlined_call_operand.hbm [shape: f32[1,256], index: 9, kind: output, shape index: {}]  }
   0x1   :  { %v14_v0 = vstv %s2009_s8 }
   0x2   :  { %15 = vst [vmem:[#allocation2] sm:$0x1] %v14_v0 }
   0x3   :  { %16 = vsyncpa [#allocation4], 0 }
   0x4   :  { %18 = vsyncpa [#allocation4 + $0x1], 0  ;;  %s1745_s11 = smov 0   ;;  %s1747_s12 = smov 0  }
   0x5   :  { %s1749_s13 = smov 0   ;;  %s1751_s14 = smov 0  }
   0x6 LB: > { %s1217_s8 = sadd.s32 4294967295, %s1685_s14   ;;  %s1218_s15 = sadd.s32 4294967294, %s1685_s14   ;;  %s1685_s14 = sphi %s1751_s14, %s2018_s14   ;;  %s1681_s13 = sphi %s1749_s13, %s2017_s13   ;;  %s1677_s12 = sphi %s1747_s12, %s2016_s12   ;;  %s1673_s11 = sphi %s1745_s11, %s2015_s11  }
   0x7   : > { %s1768_s16 = sadd.s32 1, %s1685_s14   ;;  %s225_s17 = sadd.s32 1, %s1681_s13 }
   0x8   : > { %s222_s18 = ssub.s32 %s1685_s14, %s1768_s16  ;;  %p235_p0 = scmp.ne.s32.totalorder %s1681_s13, %s1677_s12 }
   0x9   : > { %p223_p1 = scmp.eq.s32.totalorder %s222_s18, 0  ;;  %p236_p2 = scmp.eq.s32.totalorder %s1217_s8, 1 }
   0xa   : > { %p241_p3 = scmp.ne.s32.totalorder %s1677_s12, %s1673_s11  ;;  %p242_p4 = scmp.eq.s32.totalorder %s1218_s15, 1 }
   0xb   : > { %s1778_s19 = scalar_select %p223_p1, %s1681_s13, %s225_s17  }
   0xc   : > { %p1780_p5 = por %p236_p2, %p235_p0  ;;  %p1784_p6 = por %p242_p4, %p241_p3 }
   0xd   : > { %p1221_p7 = scmp.ge.s32.totalorder %s1685_s14, 1  ;;  %p293_p8 = scmp.lt.s32.totalorder %s1685_s14, 3 }
   0xf   : > { %p294_p9 = pnand %p1221_p7, %p293_p8 }
  0x10   : > { %v350_v1 = vld [vmem:[%s2002_s1] sm:$0xff] (!%p294_p9)  ;;  %v351_v2 = vld [vmem:[%s2002_s1 + $0x8] sm:$0xff] (!%p294_p9)  ;;  %v352_v3 = vld [vmem:[%s2002_s1 + $0x10] sm:$0xff] (!%p294_p9)  ;;  %s1799_s28 = sshll.u32 (!%p294_p9), %s1217_s8, 4  ;;  %vm361_vm0 = vcmask (!%p294_p9), 261120   ;;  %vm586_vm1 = vcmask (!%p294_p9), 523264  }
  0x11   : > { %297 = sbr.rel (%p294_p9) target bundleno = 976 (0x3d0), region = 56  ;;  %v1515_v4 = vpack.c.bf16 (!%p294_p9), %v351_v2, %v350_v1  ;;  %v353_v5 = vld [vmem:[%s2002_s1 + $0x18] sm:$0xff] (!%p294_p9)  ;;  %p329_p10 = scmp.lt.s32.totalorder (!%p294_p9), %s1799_s28, 31  ;;  %v571_v6 = vld [vmem:[%s2004_s3] sm:$0xff] (!%p294_p9)  ;;  %v572_v7 = vld [vmem:[%s2004_s3 + $0x8] sm:$0xff] (!%p294_p9)  ;;  %vm1688_vm2 = vmmov (!%p294_p9), 0  }
  0x12   : > { %v1519_v8 = vpack.c.bf16 (!%p294_p9), %v353_v5, %v352_v3  ;;  %v1523_v9 = vpack.c.bf16 (!%p294_p9), %v572_v7, %v571_v6  ;;  %v573_v10 = vld [vmem:[%s2004_s3 + $0x10] sm:$0xff] (!%p294_p9)  ;;  %v574_v11 = vld [vmem:[%s2004_s3 + $0x18] sm:$0xff] (!%p294_p9)  ;;  %v575_v13 = vld [vmem:[%s2004_s3 + $0x20] sm:$0xff] (!%p294_p9)  ;;  %vm1027_vm3 = vcmask (!%p294_p9), 130048   ;;  %s326_s29 = sand.u32 (!%p294_p9), 1, %s1677_s12   ;;  %s1691_s23 = smov (!%p294_p9), [#allocation3]  }
  0x13   : > { %1516 = vmatprep.subr.bf16.mxu0 (!%p294_p9), %v1515_v4  ;;  %v1527_v12 = vpack.c.bf16 (!%p294_p9), %v574_v11, %v573_v10  ;;  %v576_v14 = vld [vmem:[%s2004_s3 + $0x28] sm:$0xff] (!%p294_p9)  ;;  %v577_v32 = vld [vmem:[%s2004_s3 + $0x30] sm:$0xff] (!%p294_p9)  ;;  %v578_v33 = vld [vmem:[%s2004_s3 + $0x38] sm:$0xff] (!%p294_p9)  ;;  %s327_s30 = scalar_lea.vmem (!%p294_p9), [#allocation3], %s326_s29  ;;  %s1151_s8 = scalar_lea.sflag (!%p294_p9), [#allocation4], %s326_s29 }
  0x14   : > { %1518 = vmatpush3.bf16.msra.mxu0 (!%p294_p9), %v1515_v4  ;;  %1524 = vmatprep.subr.bf16.mxu1 (!%p294_p9), %v1523_v9  ;;  %v1531_v15 = vpack.c.bf16 (!%p294_p9), %v576_v14, %v575_v13  ;;  %v1535_v34 = vpack.c.bf16 (!%p294_p9), %v578_v33, %v577_v32  ;;  %v796_v35 = vld [vmem:[%s2006_s5] sm:$0xff] (!%p294_p9)  ;;  %v797_v36 = vld [vmem:[%s2006_s5 + $0x8] sm:$0xff] (!%p294_p9)  ;;  %v798_v37 = vld [vmem:[%s2006_s5 + $0x10] sm:$0xff] (!%p294_p9)  ;;  %s1627_s24 = sshll.u32 (!%p294_p9), %s1691_s23, 4  ;;  %s1628_s24 = int_to_ptr.vmem [resolvable:$false] %s1627_s24 }
  0x15   : > { %1520 = vmatprep.subr.bf16.mxu0 (!%p294_p9), %v1519_v8  ;;  %1526 = vmatpush3.bf16.msra.mxu1 (!%p294_p9), %v1523_v9  ;;  %v1539_v38 = vpack.c.bf16 (!%p294_p9), %v797_v36, %v796_v35  ;;  %v799_v39 = vld [vmem:[%s2006_s5 + $0x18] sm:$0xff] (!%p294_p9)  ;;  %v1224_v41 = vld [vmem:[%s2003_s2] ss:$0 sm:$0xff] (!%p294_p9)  ;;  %vm1923_vm4 = vmpackc.low (!%p294_p9), %vm1027_vm3, %vm1027_vm3 }
  0x16   : > { %1528 = vmatprep.subr.bf16.mxu1 (!%p294_p9), %v1527_v12  ;;  %v1543_v40 = vpack.c.bf16 (!%p294_p9), %v799_v39, %v798_v37 }
  0x18   : > { %s330_s25 = scalar_select %p329_p10, %s1799_s28, 31  ;;  %1522 = vmatpush3.bf16.msra.mxu0 %v1519_v8 }
  0x19   : > { %1530 = vmatpush3.bf16.msra.mxu1 %v1527_v12  ;;  %1540 = vmatprep.subr.bf16.mxu0 %v1539_v38 }
  0x1a   : > { %s1223_s10 = sshll.u32 %s330_s25, 3  ;;  %1532 = vmatprep.subr.bf16.mxu1 %v1531_v15  ;;  %s1629_s25 = scalar_lea.vmem %s1628_s24, 32 }
  0x1b   : > { %s1827_s18 = scalar_lea.vmem %s2001_s0, %s1223_s10  ;;  %s1163_s10 = sshll.u32 %s327_s30, 4  ;;  %s1961_s10 = int_to_ptr.vmem [resolvable:$true] %s1163_s10 }
  0x1c   : > { %v334_v16 = vld [vmem:[%s1827_s18] sm:$0xff]  ;;  %v335_v17 = vld [vmem:[%s1827_s18 + $0x8] sm:$0xff]  ;;  %v336_v18 = vld [vmem:[%s1827_s18 + $0x10] sm:$0xff]  ;;  %s1623_s22 = scalar_lea.vmem %s1961_s10, 16  ;;  %p1630_p0 = scmp.lt.s32.totalorder %s1961_s10, %s1628_s24 }
  0x1d   : > { %1384 = vmatprep.mubr.msk.f32.mxu0 %vm361_vm0, %v334_v16  ;;  %v337_v19 = vld [vmem:[%s1827_s18 + $0x18] sm:$0xff]  ;;  %v338_v20 = vld [vmem:[%s1827_s18 + $0x20] sm:$0xff]  ;;  %1534 = vmatpush3.bf16.msra.mxu1 %v1531_v15  ;;  %v339_v21 = vld [vmem:[%s1827_s18 + $0x28] sm:$0xff]  ;;  %p1624_p11 = scmp.ne.s32.totalorder %s1961_s10, %s1623_s22  ;;  %p1631_p1 = scmp.lt.s32.totalorder %s1629_s25, %s1623_s22 }
  0x1e   : > { %1385 = vmatmul.mubr.msk.f32.vlgmr.msra.gmra.mrb[0].mxu0 %vm361_vm0, %v335_v17  ;;  %v340_v22 = vld [vmem:[%s1827_s18 + $0x30] sm:$0xff]  ;;  %v341_v23 = vld [vmem:[%s1827_s18 + $0x38] sm:$0xff]  ;;  %v342_v24 = vld [vmem:[%s1827_s18 + $0x40] sm:$0xff]  ;;  %1536 = vmatprep.subr.bf16.mxu1 %v1535_v34 }
  0x1f   : > { %1387 = vmatprep.mubr.msk.f32.mxu0 %vm361_vm0, %v336_v18  ;;  %v343_v25 = vld [vmem:[%s1827_s18 + $0x48] sm:$0xff]  ;;  %v344_v26 = vld [vmem:[%s1827_s18 + $0x50] sm:$0xff]  ;;  %v345_v27 = vld [vmem:[%s1827_s18 + $0x58] sm:$0xff]  ;;  %1542 = vmatpush3.bf16.msra.mxu0 %v1539_v38  ;;  %p1625_p12 = pnand %p1624_p11, %p1780_p5  ;;  %p1632_p2 = por %p1631_p1, %p1630_p0 }
  0x20   : > { %v346_v28 = vld [vmem:[%s1827_s18 + $0x60] sm:$0xff]  ;;  %v347_v29 = vld [vmem:[%s1827_s18 + $0x68] sm:$0xff]  ;;  %v348_v30 = vld [vmem:[%s1827_s18 + $0x70] sm:$0xff]  ;;  %1544 = vmatprep.subr.bf16.mxu0 %v1543_v40 }
  0x21   : > { %v349_v31 = vld [vmem:[%s1827_s18 + $0x78] sm:$0xff]  ;;  %1538 = vmatpush3.bf16.msra.mxu1 %v1535_v34  ;;  %s1959_s18 = scalar_lea.hbm %s2010_s9, %s1799_s28  ;;  %p1626_p13 = pneg %p1625_p12 }
  0x22   : > { %1388 = vmatmul.mubr.msk.f32.gmra.mrb[2].mxu0 %vm361_vm0, %v337_v19 }
  0x23   : > { %1390 = vmatprep.mubr.msk.f32.mxu0 %vm361_vm0, %v338_v20  ;;  %1546 = vmatpush3.bf16.msra.mxu0 %v1543_v40  ;;  %p1633_p3 = pnand %p1632_p2, %p1626_p13 }
  0x26   : > { %1391 = vmatmul.mubr.msk.f32.gmra.mrb[4].mxu0 %vm361_vm0, %v339_v21 }
  0x27   : > { %1393 = vmatprep.mubr.msk.f32.mxu0 %vm361_vm0, %v340_v22 }
  0x2a   : > { %1394 = vmatmul.mubr.msk.f32.gmra.mrb[6].mxu0 %vm361_vm0, %v341_v23 }
  0x2b   : > { %1396 = vmatprep.mubr.msk.f32.mxu0 %vm361_vm0, %v342_v24 }
  0x2e   : > { %1397 = vmatmul.mubr.msk.f32.gmra.mrb[8].mxu0 %vm361_vm0, %v343_v25 }
  0x2f   : > { %1399 = vmatprep.mubr.msk.f32.mxu0 %vm361_vm0, %v344_v26  ;;  %v1241_v26 = vld [vmem:[%s2005_s4] ss:$0 sm:$0xff] }
  0x32   : > { %1400 = vmatmul.mubr.msk.f32.gmra.mrb[10].mxu0 %vm361_vm0, %v345_v27 }
  0x33   : > { %1402 = vmatprep.mubr.msk.f32.mxu0 %vm361_vm0, %v346_v28 }
  0x36   : > { %1403 = vmatmul.mubr.msk.f32.gmra.mrb[12].mxu0 %vm361_vm0, %v347_v29 }
  0x37   : > { %1405 = vmatprep.mubr.msk.f32.mxu0 %vm361_vm0, %v348_v30 }
  0x3a   : > { %1406 = vmatmul.mubr.msk.f32.gmra.mrb[14].mxu0 %vm361_vm0, %v349_v31 }
  0xf1   : > { %v1386_v42 = vpop.f32.mrb[0].mxu0 }
  0xf2   : > { %v482_v43 = vadd.f32 %v1386_v42, %v1224_v41  ;;  %v476_v44 = vpop.f32.mrb[1].mxu0 }
  0xf3   : > { %v477_v45 = vadd.f32 %v1224_v41, %v476_v44 }
  0xf4   : > { %v556_v48 = vmax.f32 %v482_v43, 0.0 }
  0xf5   : > { %v555_v46 = vmax.f32 %v477_v45, 0.0  ;;  %v1389_v47 = vpop.f32.mrb[2].mxu0 }
  0xf6   : > { %v492_v49 = vadd.f32 %v1389_v47, %v1224_v41  ;;  %v486_v50 = vpop.f32.mrb[3].mxu0 }
  0xf7   : > { %v487_v51 = vadd.f32 %v1224_v41, %v486_v50  ;;  %1424 = vmatprep.mubr.msk.f32.mxu1 %vm586_vm1, %v555_v46 }
  0xf8   : > { %v558_v52 = vmax.f32 %v492_v49, 0.0  ;;  %1425 = vmatmul.mubr.msk.f32.vlgmr.msra.gmra.mrb[0].mxu1 %vm586_vm1, %v556_v48 }
  0xf9   : > { %v557_v53 = vmax.f32 %v487_v51, 0.0  ;;  %v1392_v54 = vpop.f32.mrb[4].mxu0 }
  0xfa   : > { %v502_v55 = vadd.f32 %v1392_v54, %v1224_v41  ;;  %v496_v56 = vpop.f32.mrb[5].mxu0 }
  0xfb   : > { %1427 = vmatprep.mubr.msk.f32.mxu1 %vm586_vm1, %v557_v53  ;;  %v497_v57 = vadd.f32 %v1224_v41, %v496_v56 }
  0xfc   : > { %v560_v58 = vmax.f32 %v502_v55, 0.0  ;;  %1428 = vmatmul.mubr.msk.f32.gmra.mrb[2].mxu1 %vm586_vm1, %v558_v52 }
  0xfd   : > { %v559_v59 = vmax.f32 %v497_v57, 0.0  ;;  %v1395_v60 = vpop.f32.mrb[6].mxu0 }
  0xfe   : > { %v512_v61 = vadd.f32 %v1395_v60, %v1224_v41  ;;  %v506_v62 = vpop.f32.mrb[7].mxu0 }
  0xff   : > { %1430 = vmatprep.mubr.msk.f32.mxu1 %vm586_vm1, %v559_v59  ;;  %v507_v63 = vadd.f32 %v1224_v41, %v506_v62 }
 0x100   : > { %1431 = vmatmul.mubr.msk.f32.gmra.mrb[4].mxu1 %vm586_vm1, %v560_v58  ;;  %v562_v0 = vmax.f32 %v512_v61, 0.0 }
 0x101   : > { %v561_v1 = vmax.f32 %v507_v63, 0.0  ;;  %v1398_v2 = vpop.f32.mrb[8].mxu0 }
 0x102   : > { %v522_v3 = vadd.f32 %v1398_v2, %v1224_v41  ;;  %v516_v4 = vpop.f32.mrb[9].mxu0 }
 0x103   : > { %1433 = vmatprep.mubr.msk.f32.mxu1 %vm586_vm1, %v561_v1  ;;  %v517_v5 = vadd.f32 %v1224_v41, %v516_v4 }
 0x104   : > { %1434 = vmatmul.mubr.msk.f32.gmra.mrb[6].mxu1 %vm586_vm1, %v562_v0  ;;  %v564_v6 = vmax.f32 %v522_v3, 0.0 }
 0x105   : > { %v563_v7 = vmax.f32 %v517_v5, 0.0  ;;  %v1401_v8 = vpop.f32.mrb[10].mxu0 }
 0x106   : > { %v532_v9 = vadd.f32 %v1401_v8, %v1224_v41  ;;  %v526_v10 = vpop.f32.mrb[11].mxu0 }
 0x107   : > { %1436 = vmatprep.mubr.msk.f32.mxu1 %vm586_vm1, %v563_v7  ;;  %v527_v11 = vadd.f32 %v1224_v41, %v526_v10 }
 0x108   : > { %1437 = vmatmul.mubr.msk.f32.gmra.mrb[8].mxu1 %vm586_vm1, %v564_v6  ;;  %v566_v12 = vmax.f32 %v532_v9, 0.0 }
 0x109   : > { %v565_v13 = vmax.f32 %v527_v11, 0.0  ;;  %v1404_v14 = vpop.f32.mrb[12].mxu0  ;;  %v1687_v11 = vmov 0.0|0.0  }
 0x10a   : > { %v542_v15 = vadd.f32 %v1404_v14, %v1224_v41  ;;  %v536_v16 = vpop.f32.mrb[13].mxu0  ;;  %1547 = vmatprep.subr.bf16.mxu1 %v1687_v11  ;;  %v1690_v14 = vmov 0  }
 0x10b   : > { %1439 = vmatprep.mubr.msk.f32.mxu1 %vm586_vm1, %v565_v13  ;;  %v537_v17 = vadd.f32 %v1224_v41, %v536_v16  ;;  %v1017_v13 = vld [vmem:[#allocation2] sm:$0x1]  ;;  %1622 = vset.pattern.permute.xlu0 %v1690_v14 }
 0x10c   : > { %1440 = vmatmul.mubr.msk.f32.gmra.mrb[10].mxu1 %vm586_vm1, %v566_v12  ;;  %v568_v18 = vmax.f32 %v542_v15, 0.0  ;;  %v1689_v12 = vmov 0.0   ;;  %1020 = vperm.xlu0 %1622, %v1017_v13   ;;  %v1258_v15 = vld [vmem:[%s2007_s6] ss:$0 sm:$0xff] }
 0x10d   : > { %v567_v19 = vmax.f32 %v537_v17, 0.0  ;;  %v1407_v20 = vpop.f32.mrb[14].mxu0 }
 0x10e   : > { %v552_v21 = vadd.f32 %v1407_v20, %v1224_v41  ;;  %v546_v22 = vpop.f32.mrb[15].mxu0 }
 0x10f   : > { %1442 = vmatprep.mubr.msk.f32.mxu1 %vm586_vm1, %v567_v19  ;;  %v547_v23 = vadd.f32 %v1224_v41, %v546_v22 }
 0x110   : > { %1443 = vmatmul.mubr.msk.f32.gmra.mrb[12].mxu1 %vm586_vm1, %v568_v18  ;;  %v570_v24 = vmax.f32 %v552_v21, 0.0 }
 0x111   : > { %v569_v25 = vmax.f32 %v547_v23, 0.0 }
 0x113   : > { %1445 = vmatprep.mubr.msk.f32.mxu1 %vm586_vm1, %v569_v25 }
 0x114   : > { %1446 = vmatmul.mubr.msk.f32.gmra.mrb[14].mxu1 %vm586_vm1, %v570_v24 }
 0x115   : > { %1512 = vmatprep.mubr.msk.f32.mxu1 %vm1688_vm2, %v1689_v12 }
 0x18b   : > { %v1021_v14 = vpop.permute.xlu0 %1020 }
 0x1cb   : > { %v1426_v27 = vpop.f32.mrb[0].mxu1 }
 0x1cc   : > { %v707_v28 = vadd.f32 %v1426_v27, %v1241_v26  ;;  %v701_v29 = vpop.f32.mrb[1].mxu1 }
 0x1cd   : > { %v702_v30 = vadd.f32 %v1241_v26, %v701_v29 }
 0x1ce   : > { %v781_v33 = vmax.f32 %v707_v28, 0.0 }
 0x1cf   : > { %v780_v31 = vmax.f32 %v702_v30, 0.0  ;;  %v1429_v32 = vpop.f32.mrb[2].mxu1 }
 0x1d0   : > { %v717_v34 = vadd.f32 %v1429_v32, %v1241_v26  ;;  %v711_v35 = vpop.f32.mrb[3].mxu1 }
 0x1d1   : > { %v712_v36 = vadd.f32 %v1241_v26, %v711_v35  ;;  %1456 = vmatprep.mubr.msk.f32.mxu0 %vm361_vm0, %v780_v31 }
 0x1d2   : > { %v783_v37 = vmax.f32 %v717_v34, 0.0  ;;  %1457 = vmatmul.mubr.msk.f32.vlgmr.msra.gmra.mrb[16].mxu0 %vm361_vm0, %v781_v33 }
 0x1d3   : > { %v782_v38 = vmax.f32 %v712_v36, 0.0  ;;  %v1432_v39 = vpop.f32.mrb[4].mxu1 }
 0x1d4   : > { %v727_v40 = vadd.f32 %v1432_v39, %v1241_v26  ;;  %v721_v41 = vpop.f32.mrb[5].mxu1 }
 0x1d5   : > { %1459 = vmatprep.mubr.msk.f32.mxu0 %vm361_vm0, %v782_v38  ;;  %v722_v42 = vadd.f32 %v1241_v26, %v721_v41 }
 0x1d6   : > { %v785_v43 = vmax.f32 %v727_v40, 0.0  ;;  %1460 = vmatmul.mubr.msk.f32.gmra.mrb[18].mxu0 %vm361_vm0, %v783_v37 }
 0x1d7   : > { %v784_v44 = vmax.f32 %v722_v42, 0.0  ;;  %v1435_v45 = vpop.f32.mrb[6].mxu1 }
 0x1d8   : > { %v737_v46 = vadd.f32 %v1435_v45, %v1241_v26  ;;  %v731_v47 = vpop.f32.mrb[7].mxu1 }
 0x1d9   : > { %1462 = vmatprep.mubr.msk.f32.mxu0 %vm361_vm0, %v784_v44  ;;  %v732_v48 = vadd.f32 %v1241_v26, %v731_v47 }
 0x1da   : > { %1463 = vmatmul.mubr.msk.f32.gmra.mrb[20].mxu0 %vm361_vm0, %v785_v43  ;;  %v787_v49 = vmax.f32 %v737_v46, 0.0 }
 0x1db   : > { %v786_v50 = vmax.f32 %v732_v48, 0.0  ;;  %v1438_v51 = vpop.f32.mrb[8].mxu1 }
 0x1dc   : > { %v747_v52 = vadd.f32 %v1438_v51, %v1241_v26  ;;  %v741_v53 = vpop.f32.mrb[9].mxu1 }
 0x1dd   : > { %1465 = vmatprep.mubr.msk.f32.mxu0 %vm361_vm0, %v786_v50  ;;  %v742_v54 = vadd.f32 %v1241_v26, %v741_v53 }
 0x1de   : > { %1466 = vmatmul.mubr.msk.f32.gmra.mrb[22].mxu0 %vm361_vm0, %v787_v49  ;;  %v789_v55 = vmax.f32 %v747_v52, 0.0 }
 0x1df   : > { %v788_v56 = vmax.f32 %v742_v54, 0.0  ;;  %v1441_v57 = vpop.f32.mrb[10].mxu1 }
 0x1e0   : > { %v757_v58 = vadd.f32 %v1441_v57, %v1241_v26  ;;  %v751_v59 = vpop.f32.mrb[11].mxu1 }
 0x1e1   : > { %1468 = vmatprep.mubr.msk.f32.mxu0 %vm361_vm0, %v788_v56  ;;  %v752_v60 = vadd.f32 %v1241_v26, %v751_v59 }
 0x1e2   : > { %1469 = vmatmul.mubr.msk.f32.gmra.mrb[24].mxu0 %vm361_vm0, %v789_v55  ;;  %v791_v61 = vmax.f32 %v757_v58, 0.0 }
 0x1e3   : > { %v790_v62 = vmax.f32 %v752_v60, 0.0  ;;  %v1444_v63 = vpop.f32.mrb[12].mxu1 }
 0x1e4   : > { %v767_v0 = vadd.f32 %v1444_v63, %v1241_v26  ;;  %v761_v1 = vpop.f32.mrb[13].mxu1 }
 0x1e5   : > { %1471 = vmatprep.mubr.msk.f32.mxu0 %vm361_vm0, %v790_v62  ;;  %v762_v2 = vadd.f32 %v1241_v26, %v761_v1 }
 0x1e6   : > { %1472 = vmatmul.mubr.msk.f32.gmra.mrb[26].mxu0 %vm361_vm0, %v791_v61  ;;  %v793_v3 = vmax.f32 %v767_v0, 0.0 }
 0x1e7   : > { %v792_v4 = vmax.f32 %v762_v2, 0.0  ;;  %v1447_v5 = vpop.f32.mrb[14].mxu1 }
 0x1e8   : > { %v777_v6 = vadd.f32 %v1447_v5, %v1241_v26  ;;  %v771_v7 = vpop.f32.mrb[15].mxu1 }
 0x1e9   : > { %1474 = vmatprep.mubr.msk.f32.mxu0 %vm361_vm0, %v792_v4  ;;  %v772_v8 = vadd.f32 %v1241_v26, %v771_v7 }
 0x1ea   : > { %1475 = vmatmul.mubr.msk.f32.gmra.mrb[28].mxu0 %vm361_vm0, %v793_v3  ;;  %v795_v9 = vmax.f32 %v777_v6, 0.0 }
 0x1eb   : > { %v794_v10 = vmax.f32 %v772_v8, 0.0 }
 0x1ed   : > { %1477 = vmatprep.mubr.msk.f32.mxu0 %vm361_vm0, %v794_v10  ;;  %v1023_v10 = vlaneseq }
 0x1ee   : > { %1478 = vmatmul.mubr.msk.f32.gmra.mrb[30].mxu0 %vm361_vm0, %v795_v9  ;;  %v1016_v9 = vld [vmem:[%s2008_s7] sm:$0x1] }
 0x1ef   : > { %v1024_v12 = vshrl.u32 %v1023_v10, 7 }
 0x1f1   : > { %v1025_v13 = vsub.s32 0, %v1024_v12 }
 0x2a5   : > { %v1458_v16 = vpop.f32.mrb[16].mxu0 }
 0x2a6   : > { %v927_v17 = vadd.f32 %v1458_v16, %v1258_v15  ;;  %v921_v18 = vpop.f32.mrb[17].mxu0 }
 0x2a7   : > { %v922_v19 = vadd.f32 %v1258_v15, %v921_v18 }
 0x2a8   : > { %v1001_v20 = vmax.f32 %v927_v17, 0.0 }
 0x2a9   : > { %v1000_v21 = vmax.f32 %v922_v19, 0.0  ;;  %v1461_v22 = vpop.f32.mrb[18].mxu0 }
 0x2aa   : > { %v937_v23 = vadd.f32 %v1461_v22, %v1258_v15  ;;  %v931_v24 = vpop.f32.mrb[19].mxu0 }
 0x2ab   : > { %v1548_v26 = vpack.c.bf16 %v1001_v20, %v1000_v21  ;;  %v932_v27 = vadd.f32 %v1258_v15, %v931_v24 }
 0x2ac   : > { %v1003_v28 = vmax.f32 %v937_v23, 0.0 }
 0x2ad   : > { %v1002_v29 = vmax.f32 %v932_v27, 0.0  ;;  %1550 = vmatpush3.bf16.xpose.msk.msra.mxu1 %vm1923_vm4, %v1548_v26  ;;  %v1464_v30 = vpop.f32.mrb[20].mxu0 }
 0x2ae   : > { %v947_v31 = vadd.f32 %v1464_v30, %v1258_v15  ;;  %v941_v32 = vpop.f32.mrb[21].mxu0  ;;  %1551 = vmatprep.subr.bf16.mxu1 %v1687_v11 }
 0x2af   : > { %v1552_v33 = vpack.c.bf16 %v1003_v28, %v1002_v29  ;;  %v942_v34 = vadd.f32 %v1258_v15, %v941_v32 }
 0x2b0   : > { %v1005_v35 = vmax.f32 %v947_v31, 0.0 }
 0x2b1   : > { %v1004_v36 = vmax.f32 %v942_v34, 0.0  ;;  %v1467_v37 = vpop.f32.mrb[22].mxu0 }
 0x2b2   : > { %v957_v38 = vadd.f32 %v1467_v37, %v1258_v15  ;;  %v951_v39 = vpop.f32.mrb[23].mxu0 }
 0x2b3   : > { %v1556_v40 = vpack.c.bf16 %v1005_v35, %v1004_v36  ;;  %v952_v41 = vadd.f32 %v1258_v15, %v951_v39 }
 0x2b4   : > { %v1007_v42 = vmax.f32 %v957_v38, 0.0 }
 0x2b5   : > { %1554 = vmatpush3.bf16.xpose.msk.msra.mxu1 %vm1923_vm4, %v1552_v33  ;;  %v1006_v43 = vmax.f32 %v952_v41, 0.0  ;;  %v1470_v44 = vpop.f32.mrb[24].mxu0 }
 0x2b6   : > { %1555 = vmatprep.subr.bf16.mxu1 %v1687_v11  ;;  %v967_v45 = vadd.f32 %v1470_v44, %v1258_v15  ;;  %v961_v46 = vpop.f32.mrb[25].mxu0 }
 0x2b7   : > { %v1560_v47 = vpack.c.bf16 %v1007_v42, %v1006_v43  ;;  %v962_v48 = vadd.f32 %v1258_v15, %v961_v46 }
 0x2b8   : > { %v1009_v49 = vmax.f32 %v967_v45, 0.0 }
 0x2b9   : > { %v1008_v50 = vmax.f32 %v962_v48, 0.0  ;;  %v1473_v51 = vpop.f32.mrb[26].mxu0 }
 0x2ba   : > { %v977_v52 = vadd.f32 %v1473_v51, %v1258_v15  ;;  %v971_v53 = vpop.f32.mrb[27].mxu0 }
 0x2bb   : > { %v1564_v54 = vpack.c.bf16 %v1009_v49, %v1008_v50  ;;  %v972_v55 = vadd.f32 %v1258_v15, %v971_v53 }
 0x2bc   : > { %v1011_v56 = vmax.f32 %v977_v52, 0.0 }
 0x2bd   : > { %1558 = vmatpush3.bf16.xpose.msk.msra.mxu1 %vm1923_vm4, %v1556_v40  ;;  %v1010_v57 = vmax.f32 %v972_v55, 0.0  ;;  %v1476_v58 = vpop.f32.mrb[28].mxu0 }
 0x2be   : > { %1559 = vmatprep.subr.bf16.mxu1 %v1687_v11  ;;  %v987_v59 = vadd.f32 %v1476_v58, %v1258_v15  ;;  %v981_v60 = vpop.f32.mrb[29].mxu0 }
 0x2bf   : > { %v1568_v61 = vpack.c.bf16 %v1011_v56, %v1010_v57  ;;  %v982_v62 = vadd.f32 %v1258_v15, %v981_v60 }
 0x2c0   : > { %v1013_v63 = vmax.f32 %v987_v59, 0.0 }
 0x2c1   : > { %v1012_v0 = vmax.f32 %v982_v62, 0.0  ;;  %v1479_v1 = vpop.f32.mrb[30].mxu0 }
 0x2c2   : > { %v997_v2 = vadd.f32 %v1479_v1, %v1258_v15  ;;  %v991_v3 = vpop.f32.mrb[31].mxu0 }
 0x2c3   : > { %v1572_v4 = vpack.c.bf16 %v1013_v63, %v1012_v0  ;;  %v992_v5 = vadd.f32 %v1258_v15, %v991_v3  ;;  %v1026_v15 = vrot.slane %v1021_v14, %v1025_v13 }
 0x2c4   : > { %v1015_v6 = vmax.f32 %v997_v2, 0.0 }
 0x2c5   : > { %1562 = vmatpush3.bf16.xpose.msk.msra.mxu1 %vm1923_vm4, %v1560_v47  ;;  %v1014_v7 = vmax.f32 %v992_v5, 0.0 }
 0x2c6   : > { %1563 = vmatprep.subr.bf16.mxu1 %v1687_v11 }
 0x2c7   : > { %v1576_v8 = vpack.c.bf16 %v1015_v6, %v1014_v7 }
 0x2cd   : > { %1566 = vmatpush3.bf16.xpose.msk.msra.mxu1 %vm1923_vm4, %v1564_v54 }
 0x2ce   : > { %1567 = vmatprep.subr.bf16.mxu1 %v1687_v11 }
 0x2d5   : > { %1570 = vmatpush3.bf16.xpose.msk.msra.mxu1 %vm1923_vm4, %v1568_v61 }
 0x2d6   : > { %1571 = vmatprep.subr.bf16.mxu1 %v1687_v11 }
 0x2dd   : > { %1574 = vmatpush3.bf16.xpose.msk.msra.mxu1 %vm1923_vm4, %v1572_v4 }
 0x2de   : > { %1575 = vmatprep.subr.bf16.mxu1 %v1687_v11 }
 0x2e5   : > { %1578 = vmatpush3.bf16.xpose.msk.msra.mxu1 %vm1923_vm4, %v1576_v8 }
 0x2ec   : > { %1513 = vmatmul.mubr.msk.f32.vlgmr.msra.gmra.mrb[16].mxu1 %vm1027_vm3, %v1016_v9 }
 0x3bf   : > { %v1145_v16 = vpop.f32.mrb[16].mxu1 }
 0x3c0   : > { %v1146_v11 = vadd.f32 %v1145_v16, %v1026_v15  ;;  %v1514_v17 = vpop.f32.mrb[17].mxu1 }
 0x3c2   : > { %1149 = vst [vmem:[%s327_s30] sm:$0x1] %v1146_v11 }
 0x3c3   : > { %1636 = shalt.err (!%p1633_p3)
}
 0x3c4   : > { %s1637_s28 = scalar_lea.hbm %s1959_s18, 16  ;;  %s1641_s29 = scalar_lea.hbm %s2010_s9, 32 }
 0x3c5   : > { %p1638_p4 = scmp.ne.s32.totalorder %s1959_s18, %s1637_s28  ;;  %p1642_p9 = scmp.lt.u32.totalorder %s1959_s18, %s2010_s9 }
 0x3c6   : > { %p1643_p10 = scmp.lt.u32.totalorder %s1641_s29, %s1637_s28  ;;  %p1645_p12 = scmp.lt.u32.totalorder %s1637_s28, %s1959_s18 }
 0x3c7   : > { %p1639_p7 = pnand %p1638_p4, %p1780_p5 }
 0x3c8   : > { %p1644_p11 = por %p1643_p10, %p1642_p9 }
 0x3c9   : > { %p1640_p8 = pneg %p1639_p7 }
 0x3ca   : > { %p1646_p13 = por %p1645_p12, %p1644_p11 }
 0x3cc   : > { %p1647_p0 = pnand %p1646_p13, %p1640_p8 }
 0x3ce   : > { %1650 = shalt.err (!%p1647_p0)
}
 0x3cf   : > { %1579 = dma.vmem_to_hbm [thread:$0]  (%p1780_p5), %s1961_s10, 16, %s1959_s18, %s1151_s8  }
 0x3d0 PF: > { %p1585_p1 = scmp.ge.s32.totalorder %s1685_s14, 2  ;;  %s1175_s17 = sand.u32 1, %s1673_s11  }
 0x3d1   : > { %s1176_s22 = scalar_lea.sflag [#allocation4], %s1175_s17 }
 0x3d2   : > { %p1582_p2 = pnand %p1585_p1, %p1784_p6 }
 0x3d4   : > { %1668 = dma.done.wait (!%p1582_p2), %s1176_s22, 16  }
 0x3d5   : > { %1670 = vsyncadd (!%p1582_p2), %s1176_s22, 4294967280  ;;  %p21_p3 = scmp.ge.s32.totalorder %s1768_s16, 4   ;;  %s2015_s11 = smov %s1677_s12 }
 0x3d6   : > { %s2016_s12 = smov %s1681_s13  ;;  %s2017_s13 = smov %s1778_s19 }
 0x3d7   : > { %s2018_s14 = smov %s1768_s16  ;;  %23 = sbr.rel (!%p21_p3) target bundleno = 6 (0x6), region = 91 }
 0x3de   :  { %1180 = vsyncpa [#allocation4], 1 }
 0x3df   :  { %1182 = vsyncpa [#allocation4 + $0x1], 1 }

</bundles_post_ra>
